<compile_context>
chip_gen: v7x
topology: tpu7x:2x2x1
jax: 0.10.0
libtpu: 0.0.40
codegen_flags: <defaults>
</compile_context>

<pallas_src>
import functools

import jax
import jax.numpy as jnp
from jax import lax
from jax.experimental import pallas as pl
from jax.experimental.pallas import tpu as pltpu

P_DROP = 0.4
KEEP_SCALE = 1.0 / (1.0 - P_DROP)
IN_FEATURES = 100
HIDDEN = 20
OUT_FEATURES = 5

# keep iff (hash & 0x7FFFFFFF) >= thresh  ->  P(keep) = 1 - P_DROP
_KEEP_THRESH = int(P_DROP * (1 << 31))


def _ff2_kernel(seed_ref, x_ref, w1_ref, b1_ref, w2_ref, b2_ref,
                out_ref, lin_ref, *, tile_b):
    # --- dropout (inverted dropout, train-mode semantics) --------------------
    # TODO(synk): PyTorch's dropout RNG stream cannot be reproduced bit-exactly;
    # we use a deterministic counter-based hash (murmur-style fmix32) keyed on
    # (seed, global row, column).  This lowers cleanly both on TPU (Mosaic) and
    # in interpret mode, and is naturally decorrelated across batch tiles
    # because it is keyed on the *global* row index.
    x = x_ref[...]
    shape = x.shape

    row0 = (pl.program_id(0) * tile_b).astype(jnp.uint32)
    rows = lax.broadcasted_iota(jnp.uint32, shape, 0) + row0
    cols = lax.broadcasted_iota(jnp.uint32, shape, 1)
    seed = seed_ref[0].astype(jnp.uint32)

    h = rows * jnp.uint32(0x9E3779B1)
    h = h ^ (cols * jnp.uint32(0x85EBCA77))
    h = h ^ (seed * jnp.uint32(0xC2B2AE3D))
    # murmur3 fmix32 finalizer
    h = h ^ (h >> jnp.uint32(16))
    h = h * jnp.uint32(0x85EBCA6B)
    h = h ^ (h >> jnp.uint32(13))
    h = h * jnp.uint32(0xC2B2AE35)
    h = h ^ (h >> jnp.uint32(16))

    # integer-threshold keep mask, fused with the 1/(1-p) scale (single select,
    # no int->float convert of the random bits).
    h31 = (h & jnp.uint32(0x7FFFFFFF)).astype(jnp.int32)
    scale = jnp.where(h31 >= _KEEP_THRESH,
                      jnp.float32(KEEP_SCALE), jnp.float32(0.0))
    x_drop = x * scale

    # --- lin = x_drop @ W1 + b1 ----------------------------------------------
    lin = jnp.dot(x_drop, w1_ref[...], preferred_element_type=jnp.float32)
    lin = lin + b1_ref[...]
    lin_ref[...] = lin

    # --- out = relu(lin) @ W2 + b2 -------------------------------------------
    hidden = jnp.maximum(lin, 0.0)
    out = jnp.dot(hidden, w2_ref[...], preferred_element_type=jnp.float32)
    out_ref[...] = out + b2_ref[...]


def _round_up(n, m):
    return ((n + m - 1) // m) * m


def feedforward2_pallas(x, w1, b1, w2, b2, seed, *, tile_b=1024):
    """x: [B, 100] f32. Returns (out [B, 5], lin_out [B, 20])."""
    B = x.shape[0]
    # Large batch tiles amortize per-step overhead; clamp for small batches.
    tile_b = min(tile_b, _round_up(B, 8))
    grid = (pl.cdiv(B, tile_b),)
    seed_arr = jnp.asarray([seed], dtype=jnp.int32)

    kernel = functools.partial(_ff2_kernel, tile_b=tile_b)

    grid_spec = pltpu.PrefetchScalarGridSpec(
        num_scalar_prefetch=1,          # seed lands in SMEM
        grid=grid,
        in_specs=[
            # x: streamed batch tiles (double-buffered by Pallas)
            pl.BlockSpec((tile_b, IN_FEATURES), lambda i, seed: (i, 0)),
            # weights / biases: VMEM-resident across all tiles
            pl.BlockSpec((IN_FEATURES, HIDDEN), lambda i, seed: (0, 0)),
            pl.BlockSpec((1, HIDDEN), lambda i, seed: (0, 0)),
            pl.BlockSpec((HIDDEN, OUT_FEATURES), lambda i, seed: (0, 0)),
            pl.BlockSpec((1, OUT_FEATURES), lambda i, seed: (0, 0)),
        ],
        out_specs=(
            pl.BlockSpec((tile_b, OUT_FEATURES), lambda i, seed: (i, 0)),
            pl.BlockSpec((tile_b, HIDDEN), lambda i, seed: (i, 0)),
        ),
    )

    out, lin_out = pl.pallas_call(
        kernel,
        out_shape=(
            jax.ShapeDtypeStruct((B, OUT_FEATURES), jnp.float32),
            jax.ShapeDtypeStruct((B, HIDDEN), jnp.float32),
        ),
        grid_spec=grid_spec,
        compiler_params=pltpu.CompilerParams(
            dimension_semantics=("parallel",)),  # shards batch tiles across TCs
    )(seed_arr, x, w1, b1.reshape(1, -1), w2, b2.reshape(1, -1))
    return out, lin_out


def init_params(key):
    """Deterministic init mirroring nn.Linear shapes (stored as [in, out])."""
    k1, k2, k3, k4 = jax.random.split(key, 4)
    bound1 = 1.0 / (IN_FEATURES ** 0.5)
    bound2 = 1.0 / (HIDDEN ** 0.5)
    w1 = jax.random.uniform(k1, (IN_FEATURES, HIDDEN), jnp.float32,
                            -bound1, bound1)
    b1 = jax.random.uniform(k2, (HIDDEN,), jnp.float32, -bound1, bound1)
    w2 = jax.random.uniform(k3, (HIDDEN, OUT_FEATURES), jnp.float32,
                            -bound2, bound2)
    b2 = jax.random.uniform(k4, (OUT_FEATURES,), jnp.float32, -bound2, bound2)
    return w1, b1, w2, b2


if __name__ == "__main__":
    key = jax.random.PRNGKey(0)
    kx, kp = jax.random.split(key)
    B = 8
    x = jax.random.normal(kx, (B, IN_FEATURES), jnp.float32)
    w1, b1, w2, b2 = init_params(kp)

    out, lin_out = feedforward2_pallas(x, w1, b1, w2, b2, seed=0)
    jax.block_until_ready(out)
    jax.block_until_ready(lin_out)

    assert out.shape == (B, OUT_FEATURES) and out.dtype == jnp.float32
    assert lin_out.shape == (B, HIDDEN) and lin_out.dtype == jnp.float32
    assert bool(jnp.all(jnp.isfinite(out)))
    assert bool(jnp.all(jnp.isfinite(lin_out)))
    # Consistency of the second half of the fused kernel (independent of the
    # dropout RNG): out == relu(lin_out) @ W2 + b2.
    ref_out = jnp.maximum(lin_out, 0.0) @ w2 + b2
    assert bool(jnp.allclose(out, ref_out, atol=1e-5, rtol=1e-5))
    print("KERNEL_OK")
</pallas_src>

<mosaic_0001>
module attributes {stable_mosaic.version = 11 : i64} {
  func.func @_ff2_kernel(%arg0: i32, %arg1: memref<1xi32, #tpu.memory_space<smem>>, %arg2: memref<8x100xf32, #tpu.memory_space<vmem>>, %arg3: memref<100x20xf32, #tpu.memory_space<vmem>>, %arg4: memref<1x20xf32, #tpu.memory_space<vmem>>, %arg5: memref<20x5xf32, #tpu.memory_space<vmem>>, %arg6: memref<1x5xf32, #tpu.memory_space<vmem>>, %arg7: memref<8x5xf32, #tpu.memory_space<vmem>>, %arg8: memref<8x20xf32, #tpu.memory_space<vmem>>) attributes {dimension_semantics = [#tpu.dimension_semantics<parallel>], iteration_bounds = array<i64: 1>, scalar_prefetch = 1 : i64, scratch_operands = 0 : i64, tpu.core_type = #tpu.core_type<tc>, window_params = [{transform_indices = @transform_0, window_bounds = array<i64: 8, 100>}, {pipeline_mode = #tpu.pipeline_mode<synchronous>, transform_indices = @transform_1, window_bounds = array<i64: 100, 20>}, {pipeline_mode = #tpu.pipeline_mode<synchronous>, transform_indices = @transform_2, window_bounds = array<i64: 1, 20>}, {pipeline_mode = #tpu.pipeline_mode<synchronous>, transform_indices = @transform_3, window_bounds = array<i64: 20, 5>}, {pipeline_mode = #tpu.pipeline_mode<synchronous>, transform_indices = @transform_4, window_bounds = array<i64: 1, 5>}, {transform_indices = @transform_5, window_bounds = array<i64: 8, 5>}, {transform_indices = @transform_6, window_bounds = array<i64: 8, 20>}]} {
    %c0 = arith.constant 0 : index
    %c0_0 = arith.constant 0 : index
    %0 = vector.load %arg2[%c0, %c0_0] : memref<8x100xf32, #tpu.memory_space<vmem>>, vector<8x100xf32>
    %c8_i32 = arith.constant 8 : i32
    %1 = arith.muli %arg0, %c8_i32 : i32
    %2 = tpu.iota {dimensions = array<i32: 0>} : vector<8x100xi32>
    %3 = vector.broadcast %1 : i32 to vector<8x100xi32>
    %4 = arith.addi %2, %3 : vector<8x100xi32>
    %5 = tpu.iota {dimensions = array<i32: 1>} : vector<8x100xi32>
    %c0_1 = arith.constant 0 : index
    %6 = memref.load %arg1[%c0_1] : memref<1xi32, #tpu.memory_space<smem>>
    %c-1640531535_i32 = arith.constant -1640531535 : i32
    %7 = vector.broadcast %c-1640531535_i32 : i32 to vector<8x100xi32>
    %8 = arith.muli %4, %7 : vector<8x100xi32>
    %c-2048144777_i32 = arith.constant -2048144777 : i32
    %9 = vector.broadcast %c-2048144777_i32 : i32 to vector<8x100xi32>
    %10 = arith.muli %5, %9 : vector<8x100xi32>
    %11 = arith.xori %8, %10 : vector<8x100xi32>
    %c-1028477379_i32 = arith.constant -1028477379 : i32
    %12 = arith.muli %6, %c-1028477379_i32 : i32
    %13 = vector.broadcast %12 : i32 to vector<8x100xi32>
    %14 = arith.xori %11, %13 : vector<8x100xi32>
    %c16_i32 = arith.constant 16 : i32
    %15 = vector.broadcast %c16_i32 : i32 to vector<8x100xi32>
    %16 = arith.shrui %14, %15 : vector<8x100xi32>
    %17 = arith.xori %14, %16 : vector<8x100xi32>
    %c-2048144789_i32 = arith.constant -2048144789 : i32
    %18 = vector.broadcast %c-2048144789_i32 : i32 to vector<8x100xi32>
    %19 = arith.muli %17, %18 : vector<8x100xi32>
    %c13_i32 = arith.constant 13 : i32
    %20 = vector.broadcast %c13_i32 : i32 to vector<8x100xi32>
    %21 = arith.shrui %19, %20 : vector<8x100xi32>
    %22 = arith.xori %19, %21 : vector<8x100xi32>
    %c-1028477387_i32 = arith.constant -1028477387 : i32
    %23 = vector.broadcast %c-1028477387_i32 : i32 to vector<8x100xi32>
    %24 = arith.muli %22, %23 : vector<8x100xi32>
    %c16_i32_2 = arith.constant 16 : i32
    %25 = vector.broadcast %c16_i32_2 : i32 to vector<8x100xi32>
    %26 = arith.shrui %24, %25 : vector<8x100xi32>
    %27 = arith.xori %24, %26 : vector<8x100xi32>
    %c2147483647_i32 = arith.constant 2147483647 : i32
    %28 = vector.broadcast %c2147483647_i32 : i32 to vector<8x100xi32>
    %29 = arith.andi %27, %28 : vector<8x100xi32>
    %c858993459_i32 = arith.constant 858993459 : i32
    %30 = vector.broadcast %c858993459_i32 : i32 to vector<8x100xi32>
    %31 = arith.cmpi sge, %29, %30 : vector<8x100xi32>
    %cst = arith.constant 1.66666663 : f32
    %cst_3 = arith.constant 0.000000e+00 : f32
    %32 = vector.broadcast %cst : f32 to vector<8x100xf32>
    %33 = vector.broadcast %cst_3 : f32 to vector<8x100xf32>
    %34 = arith.select %31, %32, %33 : vector<8x100xi1>, vector<8x100xf32>
    %35 = arith.mulf %0, %34 : vector<8x100xf32>
    %c0_4 = arith.constant 0 : index
    %c0_5 = arith.constant 0 : index
    %36 = vector.load %arg3[%c0_4, %c0_5] : memref<100x20xf32, #tpu.memory_space<vmem>>, vector<100x20xf32>
    %cst_6 = arith.constant dense<0.000000e+00> : vector<8x20xf32>
    %37 = tpu.matmul %35, %36, %cst_6 {dimension_numbers = #tpu.dot_dimension_numbers<[1], [0], [0], [1], [0, 0, 1, 1], [], []>} : vector<8x100xf32>, vector<100x20xf32>, vector<8x20xf32> -> vector<8x20xf32>
    %c0_7 = arith.constant 0 : index
    %c0_8 = arith.constant 0 : index
    %38 = vector.load %arg4[%c0_7, %c0_8] : memref<1x20xf32, #tpu.memory_space<vmem>>, vector<1x20xf32>
    %39 = vector.broadcast %38 : vector<1x20xf32> to vector<8x20xf32>
    %40 = arith.addf %37, %39 : vector<8x20xf32>
    %c0_9 = arith.constant 0 : index
    %c0_10 = arith.constant 0 : index
    %41 = vector.load %arg8[%c0_9, %c0_10] : memref<8x20xf32, #tpu.memory_space<vmem>>, vector<8x20xf32>
    tpu.vector_store %arg8[%c0_9, %c0_10], %40 {strides = array<i32>} : memref<8x20xf32, #tpu.memory_space<vmem>>, vector<8x20xf32>,
    %cst_11 = arith.constant 0.000000e+00 : f32
    %42 = vector.broadcast %cst_11 : f32 to vector<8x20xf32>
    %43 = arith.maximumf %40, %42 : vector<8x20xf32>
    %c0_12 = arith.constant 0 : index
    %c0_13 = arith.constant 0 : index
    %44 = vector.load %arg5[%c0_12, %c0_13] : memref<20x5xf32, #tpu.memory_space<vmem>>, vector<20x5xf32>
    %cst_14 = arith.constant dense<0.000000e+00> : vector<8x5xf32>
    %45 = tpu.matmul %43, %44, %cst_14 {dimension_numbers = #tpu.dot_dimension_numbers<[1], [0], [0], [1], [0, 0, 1, 1], [], []>} : vector<8x20xf32>, vector<20x5xf32>, vector<8x5xf32> -> vector<8x5xf32>
    %c0_15 = arith.constant 0 : index
    %c0_16 = arith.constant 0 : index
    %46 = vector.load %arg6[%c0_15, %c0_16] : memref<1x5xf32, #tpu.memory_space<vmem>>, vector<1x5xf32>
    %47 = vector.broadcast %46 : vector<1x5xf32> to vector<8x5xf32>
    %48 = arith.addf %45, %47 : vector<8x5xf32>
    %c0_17 = arith.constant 0 : index
    %c0_18 = arith.constant 0 : index
    %49 = vector.load %arg7[%c0_17, %c0_18] : memref<8x5xf32, #tpu.memory_space<vmem>>, vector<8x5xf32>
    tpu.vector_store %arg7[%c0_17, %c0_18], %48 {strides = array<i32>} : memref<8x5xf32, #tpu.memory_space<vmem>>, vector<8x5xf32>,
    return
  }
  func.func @transform_0(%arg0: i32, %arg1: memref<1xi32, #tpu.memory_space<smem>>) -> (i32, i32) {
    %c0_i32 = arith.constant 0 : i32
    %c0_i32_0 = arith.constant 0 : i32
    return %arg0, %c0_i32 : i32, i32
  }
  func.func @transform_1(%arg0: i32, %arg1: memref<1xi32, #tpu.memory_space<smem>>) -> (i32, i32) {
    %c0_i32 = arith.constant 0 : i32
    %c0_i32_0 = arith.constant 0 : i32
    %c0_i32_1 = arith.constant 0 : i32
    return %c0_i32, %c0_i32_0 : i32, i32
  }
  func.func @transform_2(%arg0: i32, %arg1: memref<1xi32, #tpu.memory_space<smem>>) -> (i32, i32) {
    %c0_i32 = arith.constant 0 : i32
    %c0_i32_0 = arith.constant 0 : i32
    %c0_i32_1 = arith.constant 0 : i32
    return %c0_i32, %c0_i32_0 : i32, i32
  }
  func.func @transform_3(%arg0: i32, %arg1: memref<1xi32, #tpu.memory_space<smem>>) -> (i32, i32) {
    %c0_i32 = arith.constant 0 : i32
    %c0_i32_0 = arith.constant 0 : i32
    %c0_i32_1 = arith.constant 0 : i32
    return %c0_i32, %c0_i32_0 : i32, i32
  }
  func.func @transform_4(%arg0: i32, %arg1: memref<1xi32, #tpu.memory_space<smem>>) -> (i32, i32) {
    %c0_i32 = arith.constant 0 : i32
    %c0_i32_0 = arith.constant 0 : i32
    %c0_i32_1 = arith.constant 0 : i32
    return %c0_i32, %c0_i32_0 : i32, i32
  }
  func.func @transform_5(%arg0: i32, %arg1: memref<1xi32, #tpu.memory_space<smem>>) -> (i32, i32) {
    %c0_i32 = arith.constant 0 : i32
    %c0_i32_0 = arith.constant 0 : i32
    return %arg0, %c0_i32 : i32, i32
  }
  func.func @transform_6(%arg0: i32, %arg1: memref<1xi32, #tpu.memory_space<smem>>) -> (i32, i32) {
    %c0_i32 = arith.constant 0 : i32
    %c0_i32_0 = arith.constant 0 : i32
    return %arg0, %c0_i32 : i32, i32
  }
}

</mosaic_0001>

<bundles_post_ra>
// kernel: tpu_custom_call.1
= control target key start
LH: loop header
LB: loop body
LE: loop exit
PB: predicated region body
PF: predicated region fallthrough
CT: control target
= control target key end

     0   :  { %14 = vsyncpa [#allocation5], 0  ;;  %v28_v3 = vlaneseq  ;;  %v406_v4 = vmov 0.0|0.0   ;;  %vm407_vm0 = vmmov 0   ;;  %v408_v7 = vmov 0.0   ;;  %s537_s0 = inlined_call_operand.<no memory space> [shape: s32[1], index: 0, kind: input, shape index: {}]   ;;  %s538_s1 = inlined_call_operand.vmem [shape: f32[8,100], index: 1, kind: input, shape index: {}]   ;;  %s539_s2 = inlined_call_operand.vmem [shape: f32[100,20], index: 2, kind: input, shape index: {}]   ;;  %s540_s3 = inlined_call_operand.vmem [shape: f32[1,20], index: 3, kind: input, shape index: {}]   ;;  %s541_s4 = inlined_call_operand.vmem [shape: f32[20,5], index: 4, kind: input, shape index: {}]   ;;  %s542_s5 = inlined_call_operand.vmem [shape: f32[1,5], index: 5, kind: input, shape index: {}]   ;;  %s543_s6 = inlined_call_operand.hbm [shape: f32[8,5], index: 6, kind: output, shape index: {0}]   ;;  %s544_s7 = inlined_call_operand.hbm [shape: f32[8,20], index: 7, kind: output, shape index: {1}]  }
   0x1   :  { %v53_v0 = vld [vmem:[%s539_s2] sm:$0xff]  ;;  %v54_v1 = vld [vmem:[%s539_s2 + $0x8] sm:$0xff]  ;;  %v55_v2 = vld [vmem:[%s539_s2 + $0x10] sm:$0xff]  ;;  %332 = vmatprep.subr.bf16.mxu0 %v406_v4  ;;  %350 = vmatprep.subr.bf16.mxu1 %v406_v4  ;;  %s38_s11 = smul.u32 3266489917, %s537_s0 }
   0x2   :  { %v333_v5 = vpack.c.bf16 %v54_v1, %v53_v0  ;;  %v56_v6 = vld [vmem:[%s539_s2 + $0x18] sm:$0xff]  ;;  %320 = vmatprep.mubr.msk.f32.mxu0 %vm407_vm0, %v408_v7  ;;  %v29_v8 = vshrl.u32 %v28_v3, 7  ;;  %v33_v9 = vand.u32 127, %v28_v3  ;;  %329 = vmatprep.mubr.msk.f32.mxu1 %vm407_vm0, %v408_v7  ;;  %v57_v11 = vld [vmem:[%s539_s2 + $0x20] sm:$0xff]  ;;  %v58_v12 = vld [vmem:[%s539_s2 + $0x28] sm:$0xff] }
   0x3   :  { %v336_v10 = vpack.c.bf16 %v56_v6, %v55_v2 }
   0x4   :  { %334 = vmatpush3.bf16.msra.mxu0 %v333_v5  ;;  %v35_v13 = vmul.u32 2654435761, %v29_v8  ;;  %v36_v14 = vmul.u32 2246822519, %v33_v9 }
   0x5   :  { %335 = vmatprep.subr.bf16.mxu0 %v406_v4 }
   0x6   :  { %15 = vsyncpa [#allocation7], 0  ;;  %v39_v15 = vstv %s38_s11  ;;  %v339_v16 = vpack.c.bf16 %v58_v12, %v57_v11  ;;  %v37_v17 = vxor.u32 %v36_v14, %v35_v13  ;;  %v59_v18 = vld [vmem:[%s539_s2 + $0x30] sm:$0xff]  ;;  %v60_v19 = vld [vmem:[%s539_s2 + $0x38] sm:$0xff]  ;;  %vm77_vm1 = vcmask 1043456   ;;  %s409_s14 = smov [#allocation6]  }
   0x7   :  { %v342_v21 = vpack.c.bf16 %v60_v19, %v59_v18  ;;  %v61_v23 = vld [vmem:[%s539_s2 + $0x40] sm:$0xff]  ;;  %v62_v24 = vld [vmem:[%s539_s2 + $0x48] sm:$0xff]  ;;  %v63_v28 = vld [vmem:[%s539_s2 + $0x50] sm:$0xff]  ;;  %vm73_vm3 = vcmask 818176   ;;  %vm151_vm4 = vcmask 162816   ;;  %s258_s15 = sshll.u32 %s409_s14, 4  ;;  %s259_s15 = int_to_ptr.vmem [resolvable:$true] %s258_s15 }
   0x8   :  { %337 = vmatpush3.bf16.msra.mxu0 %v336_v10  ;;  %v40_v20 = vxor.u32 %v39_v15, %v37_v17  ;;  %v345_v26 = vpack.c.bf16 %v62_v24, %v61_v23  ;;  %v64_v29 = vld [vmem:[%s539_s2 + $0x58] sm:$0xff]  ;;  %v65_v35 = vld [vmem:[%s539_s2 + $0x60] sm:$0xf]  ;;  %v155_v42 = vld [vmem:[%s541_s4 + $0x8] sm:$0xff]  ;;  %s358_s0 = scalar_lea.vmem %s259_s15, 128  ;;  %p363_p1 = scmp.lt.s32.totalorder %s259_s15, %s259_s15 }
   0x9   :  { %338 = vmatprep.subr.bf16.mxu0 %v406_v4  ;;  %v348_v31 = vpack.c.bf16 %v64_v29, %v63_v28  ;;  %v26_v38 = vld [vmem:[%s538_s1] sm:$0xff]  ;;  %v156_v44 = vld [vmem:[%s541_s4 + $0x10] sm:$0xf]  ;;  %p359_p0 = scmp.ne.s32.totalorder %s259_s15, %s358_s0  ;;  %p364_p2 = scmp.lt.s32.totalorder %s358_s0, %s358_s0 }
   0xa   :  { %v41_v22 = vshrl.u32 %v40_v20, 16  ;;  %v154_v41 = vld [vmem:[%s541_s4] sm:$0xff] }
   0xb   :  { %v351_v43 = vpack.c.bf16 %v155_v42, %v154_v41  ;;  %v270_v45 = vld [vmem:[%s540_s3] ss:$0 sm:$0xff]  ;;  %p365_p3 = por %p364_p2, %p363_p1 }
   0xc   :  { %340 = vmatpush3.bf16.msra.mxu0 %v339_v16  ;;  %v42_v25 = vxor.u32 %v41_v22, %v40_v20 }
   0xd   :  { %341 = vmatprep.subr.bf16.mxu0 %v406_v4  ;;  %352 = vmatpush3.bf16.msra.mxu1 %v351_v43  ;;  %p366_p4 = pnand %p365_p3, %p359_p0 }
   0xe   :  { %v43_v27 = vmul.u32 2246822507, %v42_v25  ;;  %327 = vmatprep.subr.mxu1 %v408_v7 }
  0x10   :  { %343 = vmatpush3.bf16.msra.mxu0 %v342_v21  ;;  %v44_v30 = vshrl.u32 %v43_v27, 13 }
  0x11   :  { %344 = vmatprep.subr.bf16.mxu0 %v406_v4  ;;  %328 = vmatpush3.msk.msra.mxu1 %vm77_vm1, %v156_v44 }
  0x12   :  { %v45_v32 = vxor.u32 %v44_v30, %v43_v27 }
  0x14   :  { %346 = vmatpush3.bf16.msra.mxu0 %v345_v26  ;;  %v46_v33 = vmul.u32 3266489909, %v45_v32 }
  0x15   :  { %347 = vmatprep.subr.bf16.mxu0 %v406_v4 }
  0x16   :  { %v47_v34 = vshrl.u32 %v46_v33, 16 }
  0x18   :  { %349 = vmatpush3.bf16.msra.mxu0 %v348_v31  ;;  %v48_v36 = vxor.u32 %v47_v34, %v46_v33 }
  0x19   :  { %318 = vmatprep.subr.mxu0 %v408_v7 }
  0x1a   :  { %v49_v37 = vand.u32 2147483647, %v48_v36 }
  0x1c   :  { %319 = vmatpush3.msk.msra.mxu0 %vm77_vm1, %v65_v35  ;;  %vm50_vm2 = vcmp.ge.s32.totalorder %v49_v37, 858993459 }
  0x1d   :  { %v51_v39 = vsel %vm50_vm2, 1.6666666, %v408_v7 }
  0x1e   :  { %v52_v40 = vmul.f32 %v51_v39, %v26_v38 }
  0x20   :  { %321 = vmatmul.mubr.msk.f32.vlgmr.msra.gmra.mrb[0].mxu0 %vm73_vm3, %v52_v40 }
  0xf3   :  { %v147_v46 = vpop.f32.mrb[0].mxu0 }
  0xf4   :  { %v148_v47 = vadd.f32 %v270_v45, %v147_v46  ;;  %v322_v48 = vpop.f32.mrb[1].mxu0 }
  0xf6   :  { %v153_v49 = vmax.f32 %v148_v47, 0.0  ;;  %152 = vst.msk [vmem:[#allocation6] sm:$0xff] %vm151_vm4, %v148_v47 }
  0xf8   :  { %330 = vmatmul.mubr.msk.f32.vlgmr.msra.gmra.mrb[0].mxu1 %vm151_vm4, %v153_v49 }
  0xf9   :  { %369 = shalt.err (!%p366_p4)
}
  0xfa   :  { %s370_s3 = scalar_lea.hbm %s544_s7, 128 }
  0xfb   :  { %p371_p5 = scmp.ne.s32.totalorder %s544_s7, %s370_s3  ;;  %p374_p6 = scmp.lt.u32.totalorder %s370_s3, %s544_s7 }
  0xfd   :  { %p376_p7 = pnand %p374_p6, %p371_p5 }
  0xff   :  { %379 = shalt.err (!%p376_p7)
}
 0x100   :  { %261 = dma.vmem_to_hbm [thread:$0]  %s259_s15, 128, %s544_s7, [#allocation7]   ;;  %v273_v50 = vld [vmem:[%s542_s5] ss:$0 sm:$0xff]  ;;  %vm240_vm5 = vcmask 39936  }
 0x101   :  { %s410_s25 = smov [#allocation4]  }
 0x102   :  { %s248_s26 = sshll.u32 %s410_s25, 4  ;;  %s249_s26 = int_to_ptr.vmem [resolvable:$true] %s248_s26 }
 0x103   :  { %s380_s27 = scalar_lea.vmem %s249_s26, 128  ;;  %p385_p9 = scmp.lt.s32.totalorder %s249_s26, %s249_s26 }
 0x104   :  { %p381_p8 = scmp.ne.s32.totalorder %s249_s26, %s380_s27  ;;  %p386_p10 = scmp.lt.s32.totalorder %s380_s27, %s380_s27 }
 0x106   :  { %p387_p11 = por %p386_p10, %p385_p9 }
 0x108   :  { %p388_p12 = pnand %p387_p11, %p381_p8 }
 0x1cb   :  { %v236_v51 = vpop.f32.mrb[0].mxu1 }
 0x1cc   :  { %v237_v52 = vadd.f32 %v273_v50, %v236_v51  ;;  %v331_v53 = vpop.f32.mrb[1].mxu1 }
 0x1ce   :  { %241 = vst.msk [vmem:[#allocation4] sm:$0xff] %vm240_vm5, %v237_v52 }
 0x1cf   :  { %391 = shalt.err (!%p388_p12)
}
 0x1d0   :  { %s392_s29 = scalar_lea.hbm %s543_s6, 128 }
 0x1d1   :  { %p393_p13 = scmp.ne.s32.totalorder %s543_s6, %s392_s29  ;;  %p396_p0 = scmp.lt.u32.totalorder %s392_s29, %s543_s6 }
 0x1d3   :  { %p398_p1 = pnand %p396_p0, %p393_p13 }
 0x1d5   :  { %401 = shalt.err (!%p398_p1)
}
 0x1d6   :  { %251 = dma.vmem_to_hbm [thread:$0]  %s249_s26, 128, %s543_s6, [#allocation5]  }
 0x1d7   :  { %402 = dma.done.wait [#allocation5], 128  }
 0x1d8   :  { %403 = vsyncadd [#allocation5], 4294967168 }
 0x1d9   :  { %404 = dma.done.wait [#allocation7], 128  }
 0x1da   :  { %405 = vsyncadd [#allocation7], 4294967168 }
 0x1db   :  { %268 = vsyncpa [#allocation5], 1 }
 0x1dc   :  { %269 = vsyncpa [#allocation7], 1 }

</bundles_post_ra>
